<compile_context>
chip_gen: v7x
topology: tpu7x:2x2x1
jax: 0.10.0
libtpu: 0.0.40
codegen_flags: <defaults>
</compile_context>

<pallas_src>
import functools

import jax
import jax.numpy as jnp
from jax.experimental import pallas as pl
from jax.experimental.pallas import tpu as pltpu


def _round_up(x, m):
    return ((x + m - 1) // m) * m


def _mlp_kernel(x_ref, w1_ref, b1_ref, w2_ref, b2_ref, o_ref, *, apply_softmax):
    # fc1 (bf16 x bf16 -> f32 acc) + bias + ReLU, all in f32.
    h = jnp.dot(x_ref[...], w1_ref[...], preferred_element_type=jnp.float32)
    h = jnp.maximum(h + b1_ref[...], 0.0)                 # (TB, H) + (1, H)
    # fc2 (bf16 x bf16 -> f32 acc) + bias.
    logits = jnp.dot(h.astype(jnp.bfloat16), w2_ref[...],
                     preferred_element_type=jnp.float32)
    logits = logits + b2_ref[...]                         # (TB, V) + (1, V)
    if apply_softmax:
        # Numerically-stable softmax with an EXACT f32 division.
        # (approx reciprocal previously broke the rows-sum-to-1 property.)
        m = jnp.max(logits, axis=-1, keepdims=True)
        e = jnp.exp(logits - m)
        denom = jnp.sum(e, axis=-1, keepdims=True)
        o_ref[...] = e / denom
    else:
        o_ref[...] = logits


def prepare_params(emb_table, w1, b1, w2, b2):
    """One-time parameter preparation (hoisted out of the per-call forward):
    bf16 casts of embedding/weights + 2-D f32 biases."""
    return dict(
        emb=emb_table.astype(jnp.bfloat16),
        w1=w1.astype(jnp.bfloat16),
        b1=b1.reshape(1, -1).astype(jnp.float32),
        w2=w2.astype(jnp.bfloat16),
        b2=b2.reshape(1, -1).astype(jnp.float32),
    )


def commit_language_modeler_forward(x_tokens, params, apply_softmax=True,
                                     block_batch=None):
    """x_tokens: int32 (B, context). params: output of prepare_params().
    Returns float32 (B, vocab)."""
    B, C = x_tokens.shape
    emb = params["emb"]
    w1, b1 = params["w1"], params["b1"]
    w2, b2 = params["w2"], params["b2"]
    V, E = emb.shape
    D = C * E                     # flattened embedding dim (fc1 input)
    H = w1.shape[1]               # 128

    # Batch tile: large by default to amortize the ~0.35 us/grid-step cost,
    # but split into >= 2 blocks when the batch allows it so the "parallel"
    # axis actually feeds both TensorCores on v7x.
    if block_batch is None:
        block_batch = 1024
    TB = max(8, min(_round_up(block_batch, 8), _round_up(B, 8)))
    if TB >= B and B > 8:
        TB = _round_up(pl.cdiv(B, 2), 8)
    n_blocks = pl.cdiv(B, TB)
    B_pad = n_blocks * TB

    # Pad the int32 tokens (B x C), not the bf16 activations (B x D).
    if B_pad != B:
        x_tokens = jnp.pad(x_tokens, ((0, B_pad - B), (0, 0)))

    # Glue: embedding row-gather + flatten (data-dependent indexing stays in
    # XLA; allow_input_fusion lets XLA fuse the producer into input 0's DMA
    # when legal).
    # TODO(synk): move the gather in-kernel (resident VMEM emb table + one-hot
    # MXU lookup) to guarantee no x_flat HBM round trip.
    x_flat = jnp.take(emb, x_tokens, axis=0).reshape(B_pad, D)

    kernel = functools.partial(_mlp_kernel, apply_softmax=bool(apply_softmax))

    # Explicit VMEM budget sized from the tiles (double-buffered) + headroom,
    # capped under v7x's 64 MiB physical VMEM.
    tile_bytes = (2 * TB * D * 2              # bf16 input tiles (x2 buffers)
                  + 2 * TB * V * 4            # f32 output tiles (x2 buffers)
                  + 2 * (D * H + H * V) * 2   # bf16 weights (x2 buffers)
                  + 2 * (H + V) * 4)          # f32 biases
    vmem_limit = int(min(max(2 * tile_bytes + (8 << 20), 32 << 20), 64 << 20))

    # TODO(synk): for large vocabularies (V >~ 8-16K) add a vocab grid axis
    # (tile W2/b2/out along V with an online/two-pass softmax) instead of
    # keeping (H, V) resident — first VMEM wall on v7x.
    out = pl.pallas_call(
        kernel,
        out_shape=jax.ShapeDtypeStruct((B_pad, V), jnp.float32),
        grid_spec=pltpu.PrefetchScalarGridSpec(
            num_scalar_prefetch=0,
            grid=(n_blocks,),
            in_specs=[
                pl.BlockSpec((TB, D), lambda i: (i, 0)),   # streamed activations
                pl.BlockSpec((D, H), lambda i: (0, 0)),    # W1 resident
                pl.BlockSpec((1, H), lambda i: (0, 0)),    # b1 resident
                pl.BlockSpec((H, V), lambda i: (0, 0)),    # W2 resident
                pl.BlockSpec((1, V), lambda i: (0, 0)),    # b2 resident
            ],
            out_specs=pl.BlockSpec((TB, V), lambda i: (i, 0)),
        ),
        compiler_params=pltpu.CompilerParams(
            dimension_semantics=("parallel",),
            vmem_limit_bytes=vmem_limit,
            allow_input_fusion=[True, False, False, False, False],
        ),
    )(x_flat, w1, b1, w2, b2)

    return out[:B]


def _init_params(key, vocab_size, emb_size, context_size, hidden=128):
    """Deterministic synthetic params mirroring the PyTorch module shapes."""
    k_emb, k_w1, k_b1, k_w2, k_b2 = jax.random.split(key, 5)
    D = context_size * emb_size
    emb_table = jax.random.normal(k_emb, (vocab_size, emb_size), jnp.float32)
    # PyTorch Linear: weight (out, in). We store (in, out) for x @ W.
    lim1 = 1.0 / jnp.sqrt(D)
    w1 = jax.random.uniform(k_w1, (D, hidden), jnp.float32, -lim1, lim1)
    b1 = jax.random.uniform(k_b1, (hidden,), jnp.float32, -lim1, lim1)
    lim2 = 1.0 / jnp.sqrt(hidden)
    w2 = jax.random.uniform(k_w2, (hidden, vocab_size), jnp.float32, -lim2, lim2)
    b2 = jax.random.uniform(k_b2, (vocab_size,), jnp.float32, -lim2, lim2)
    return emb_table, w1, b1, w2, b2


if __name__ == "__main__":
    # Small shapes consistent with the module: context=8, emb=16 -> fc1 in = 128.
    # batch=60 exercises both the token-padding path and a 2-block grid.
    batch = 60
    context_size = 8
    embedding_size = 16
    vocabulary_size = 256

    key = jax.random.PRNGKey(0)
    k_params, k_tokens = jax.random.split(key)
    emb_table, w1, b1, w2, b2 = _init_params(
        k_params, vocabulary_size, embedding_size, context_size)
    params = prepare_params(emb_table, w1, b1, w2, b2)   # one-time prep

    x_tokens = jax.random.randint(
        k_tokens, (batch, context_size), 0, vocabulary_size, dtype=jnp.int32)

    # Softmax path (default TB logic -> TB=32, grid=(2,), padded to 64 rows).
    probs = commit_language_modeler_forward(
        x_tokens, params, apply_softmax=True)
    probs = jax.block_until_ready(probs)

    # Logits path (apply_softmax=False honored via static specialization).
    logits = commit_language_modeler_forward(
        x_tokens, params, apply_softmax=False)
    logits = jax.block_until_ready(logits)

    # Pure-JAX f32 reference of the same forward (kernel uses bf16 inputs with
    # f32 accumulation, so tolerances are relaxed vs pure f32).
    x_flat = jnp.take(emb_table, x_tokens, axis=0).reshape(batch, -1)
    h_ref = jnp.maximum(x_flat @ w1 + b1, 0.0)
    ref_logits = h_ref @ w2 + b2
    ref_probs = jax.nn.softmax(ref_logits, axis=-1)

    assert probs.shape == (batch, vocabulary_size)
    assert logits.shape == (batch, vocabulary_size)
    assert jnp.allclose(jnp.sum(probs, axis=-1), 1.0, atol=1e-3), "rows not normalized"
    assert jnp.allclose(probs, ref_probs, atol=3e-3), "softmax mismatch vs JAX reference"
    assert jnp.allclose(logits, ref_logits, atol=5e-2), "logits mismatch vs JAX reference"

    print("KERNEL_OK")
</pallas_src>

<mosaic_0001>
module attributes {stable_mosaic.version = 11 : i64} {
  func.func @_mlp_kernel(%arg0: i32, %arg1: memref<32x128xbf16, #tpu.memory_space<vmem>>, %arg2: memref<128x128xbf16, #tpu.memory_space<vmem>>, %arg3: memref<1x128xf32, #tpu.memory_space<vmem>>, %arg4: memref<128x256xbf16, #tpu.memory_space<vmem>>, %arg5: memref<1x256xf32, #tpu.memory_space<vmem>>, %arg6: memref<32x256xf32, #tpu.memory_space<vmem>>) attributes {dimension_semantics = [#tpu.dimension_semantics<parallel>], iteration_bounds = array<i64: 2>, scalar_prefetch = 0 : i64, scratch_operands = 0 : i64, tpu.core_type = #tpu.core_type<tc>, window_params = [{transform_indices = @transform_0, window_bounds = array<i64: 32, 128>}, {pipeline_mode = #tpu.pipeline_mode<synchronous>, transform_indices = @transform_1, window_bounds = array<i64: 128, 128>}, {pipeline_mode = #tpu.pipeline_mode<synchronous>, transform_indices = @transform_2, window_bounds = array<i64: 1, 128>}, {pipeline_mode = #tpu.pipeline_mode<synchronous>, transform_indices = @transform_3, window_bounds = array<i64: 128, 256>}, {pipeline_mode = #tpu.pipeline_mode<synchronous>, transform_indices = @transform_4, window_bounds = array<i64: 1, 256>}, {transform_indices = @transform_5, window_bounds = array<i64: 32, 256>}]} {
    %c0 = arith.constant 0 : index
    %c0_0 = arith.constant 0 : index
    %0 = vector.load %arg1[%c0, %c0_0] : memref<32x128xbf16, #tpu.memory_space<vmem>>, vector<32x128xbf16>
    %c0_1 = arith.constant 0 : index
    %c0_2 = arith.constant 0 : index
    %1 = vector.load %arg2[%c0_1, %c0_2] : memref<128x128xbf16, #tpu.memory_space<vmem>>, vector<128x128xbf16>
    %cst = arith.constant dense<0.000000e+00> : vector<32x128xf32>
    %2 = tpu.matmul %0, %1, %cst {dimension_numbers = #tpu.dot_dimension_numbers<[1], [0], [0], [1], [0, 0, 1, 1], [], []>} : vector<32x128xbf16>, vector<128x128xbf16>, vector<32x128xf32> -> vector<32x128xf32>
    %c0_3 = arith.constant 0 : index
    %c0_4 = arith.constant 0 : index
    %3 = vector.load %arg3[%c0_3, %c0_4] : memref<1x128xf32, #tpu.memory_space<vmem>>, vector<1x128xf32>
    %4 = vector.broadcast %3 : vector<1x128xf32> to vector<32x128xf32>
    %5 = arith.addf %2, %4 : vector<32x128xf32>
    %cst_5 = arith.constant 0.000000e+00 : f32
    %6 = vector.broadcast %cst_5 : f32 to vector<32x128xf32>
    %7 = arith.maximumf %5, %6 : vector<32x128xf32>
    %8 = arith.truncf %7 : vector<32x128xf32> to vector<32x128xbf16>
    %c0_6 = arith.constant 0 : index
    %c0_7 = arith.constant 0 : index
    %9 = vector.load %arg4[%c0_6, %c0_7] : memref<128x256xbf16, #tpu.memory_space<vmem>>, vector<128x256xbf16>
    %cst_8 = arith.constant dense<0.000000e+00> : vector<32x256xf32>
    %10 = tpu.matmul %8, %9, %cst_8 {dimension_numbers = #tpu.dot_dimension_numbers<[1], [0], [0], [1], [0, 0, 1, 1], [], []>} : vector<32x128xbf16>, vector<128x256xbf16>, vector<32x256xf32> -> vector<32x256xf32>
    %c0_9 = arith.constant 0 : index
    %c0_10 = arith.constant 0 : index
    %11 = vector.load %arg5[%c0_9, %c0_10] : memref<1x256xf32, #tpu.memory_space<vmem>>, vector<1x256xf32>
    %12 = vector.broadcast %11 : vector<1x256xf32> to vector<32x256xf32>
    %13 = arith.addf %10, %12 : vector<32x256xf32>
    %cst_11 = arith.constant dense<0xFF800000> : vector<32xf32>
    %14 = vector.multi_reduction <maximumf>, %13, %cst_11 [1] : vector<32x256xf32> to vector<32xf32>
    %15 = vector.shape_cast %14 : vector<32xf32> to vector<32x1xf32>
    %16 = vector.broadcast %15 : vector<32x1xf32> to vector<32x256xf32>
    %17 = arith.subf %13, %16 : vector<32x256xf32>
    %18 = math.exp %17 : vector<32x256xf32>
    %cst_12 = arith.constant dense<0.000000e+00> : vector<32xf32>
    %19 = vector.multi_reduction <add>, %18, %cst_12 [1] : vector<32x256xf32> to vector<32xf32>
    %20 = vector.shape_cast %19 : vector<32xf32> to vector<32x1xf32>
    %21 = vector.broadcast %20 : vector<32x1xf32> to vector<32x256xf32>
    %22 = arith.divf %18, %21 : vector<32x256xf32>
    %c0_13 = arith.constant 0 : index
    %c0_14 = arith.constant 0 : index
    %23 = vector.load %arg6[%c0_13, %c0_14] : memref<32x256xf32, #tpu.memory_space<vmem>>, vector<32x256xf32>
    tpu.vector_store %arg6[%c0_13, %c0_14], %22 {strides = array<i32>} : memref<32x256xf32, #tpu.memory_space<vmem>>, vector<32x256xf32>,
    return
  }
  func.func @transform_0(%arg0: i32) -> (i32, i32) {
    %c0_i32 = arith.constant 0 : i32
    %c0_i32_0 = arith.constant 0 : i32
    return %arg0, %c0_i32 : i32, i32
  }
  func.func @transform_1(%arg0: i32) -> (i32, i32) {
    %c0_i32 = arith.constant 0 : i32
    %c0_i32_0 = arith.constant 0 : i32
    %c0_i32_1 = arith.constant 0 : i32
    return %c0_i32, %c0_i32_0 : i32, i32
  }
  func.func @transform_2(%arg0: i32) -> (i32, i32) {
    %c0_i32 = arith.constant 0 : i32
    %c0_i32_0 = arith.constant 0 : i32
    %c0_i32_1 = arith.constant 0 : i32
    return %c0_i32, %c0_i32_0 : i32, i32
  }
  func.func @transform_3(%arg0: i32) -> (i32, i32) {
    %c0_i32 = arith.constant 0 : i32
    %c0_i32_0 = arith.constant 0 : i32
    %c0_i32_1 = arith.constant 0 : i32
    return %c0_i32, %c0_i32_0 : i32, i32
  }
  func.func @transform_4(%arg0: i32) -> (i32, i32) {
    %c0_i32 = arith.constant 0 : i32
    %c0_i32_0 = arith.constant 0 : i32
    %c0_i32_1 = arith.constant 0 : i32
    return %c0_i32, %c0_i32_0 : i32, i32
  }
  func.func @transform_5(%arg0: i32) -> (i32, i32) {
    %c0_i32 = arith.constant 0 : i32
    %c0_i32_0 = arith.constant 0 : i32
    return %arg0, %c0_i32 : i32, i32
  }
}

</mosaic_0001>

<bundles_post_ra>
// kernel: tpu_custom_call.1
= control target key start
LH: loop header
LB: loop body
LE: loop exit
PB: predicated region body
PF: predicated region fallthrough
CT: control target
= control target key end

     0   :  { %10 = vsyncpa [#allocation3], 0  ;;  %s1414_s0 = inlined_call_operand.hbm [shape: bf16[64,128], index: 0, kind: input, shape index: {}]   ;;  %s1415_s1 = inlined_call_operand.hbm [shape: bf16[128,128], index: 1, kind: input, shape index: {}]   ;;  %s1416_s2 = inlined_call_operand.vmem [shape: f32[1,128], index: 2, kind: input, shape index: {}]   ;;  %s1417_s3 = inlined_call_operand.hbm [shape: bf16[128,256], index: 3, kind: input, shape index: {}]   ;;  %s1418_s4 = inlined_call_operand.vmem [shape: f32[1,256], index: 4, kind: input, shape index: {}]   ;;  %s1419_s5 = inlined_call_operand.hbm [shape: f32[64,256], index: 5, kind: output, shape index: {}]  }
   0x1   :  { %12 = vsyncpa [#allocation3 + $0x1], 0 }
   0x2   :  { %13 = vsyncpa [#allocation6], 0 }
   0x3   :  { %14 = vsyncpa [#allocation4], 0 }
   0x4   :  { %16 = vsyncpa [#allocation4 + $0x1], 0  ;;  %s1163_s18 = smov 0   ;;  %s1165_s19 = smov 0  }
   0x5   :  { %s1167_s20 = smov 0   ;;  %s1169_s21 = smov 0  }
   0x6 LB: > { %s1184_s22 = sadd.s32 4294967295, %s1120_s21   ;;  %s753_s23 = sadd.s32 4294967294, %s1120_s21   ;;  %s1120_s21 = sphi %s1169_s21, %s1439_s21   ;;  %s1116_s20 = sphi %s1167_s20, %s1438_s20   ;;  %s1112_s19 = sphi %s1165_s19, %s1437_s19   ;;  %s1108_s18 = sphi %s1163_s18, %s1436_s18  }
   0x7   : > { %p42_p0 = scmp.ne.s32.totalorder %s1112_s19, %s1108_s18  ;;  %p1420_p1 = scmp.eq.s32.totalorder %s1184_s22, 0 }
   0x8   : > { %p156_p3 = scmp.eq.s32.totalorder %s753_s23, 1  ;;  %p754_p5 = scmp.ge.s32.totalorder %s1120_s21, 1 }
   0x9   : > { %p1193_p4 = por %p1420_p1, %p42_p0  ;;  %p163_p7 = scmp.lt.s32.totalorder %s1120_s21, 3 }
   0xa   : > { %p1198_p6 = por %p156_p3, %p42_p0  ;;  %s1122_s27 = smov [#allocation5]  }
   0xb   : > { %s1423_s24 = scalar_select %p1193_p4, 1, 0 }
   0xc   : > { %s1424_s25 = scalar_select %p1198_p6, 1, 0 }
   0xd   : > { %p1203_p8 = pnand %p754_p5, %p163_p7  ;;  %s175_s28 = sshll.u32 %s1122_s27, 4  ;;  %s1207_s28 = int_to_ptr.vmem [resolvable:$true] %s175_s28 }
   0xe   : > { %s1123_s30 = smov [#allocation7]   ;;  %s964_s9 = scalar_lea.hbm %s1415_s1, 1024 }
   0xf   : > { %p844_p9 = pneg %p1203_p8  ;;  %s191_s6 = sshll.u32 %s1123_s30, 4  ;;  %s1218_s6 = int_to_ptr.vmem [resolvable:$true] %s191_s6 }
  0x10   : > { %p965_p12 = scmp.ne.s32.totalorder %s1415_s1, %s964_s9  ;;  %p971_p5 = scmp.lt.u32.totalorder %s964_s9, %s1415_s1 }
  0x11   : > { %p1214_p11 = pnand %p844_p9, %p1420_p1 }
  0x13   : > { %p966_p13 = pneg %p1214_p11 }
  0x15   : > { %p967_p0 = pnand %p966_p13, %p965_p12 }
  0x17   : > { %p968_p3 = pneg %p967_p0 }
  0x19   : > { %p973_p7 = pnand %p971_p5, %p968_p3 }
  0x1b   : > { %976 = shalt.err (!%p973_p7)
}
  0x1c   : > { %s977_s14 = scalar_lea.vmem %s1207_s28, 1024  ;;  %p985_p2 = scmp.lt.s32.totalorder %s1207_s28, %s1207_s28 }
  0x1d   : > { %p978_p9 = scmp.ne.s32.totalorder %s1207_s28, %s977_s14  ;;  %p986_p12 = scmp.lt.s32.totalorder %s977_s14, %s977_s14 }
  0x1f   : > { %p980_p10 = pnand %p978_p9, %p966_p13  ;;  %p987_p0 = por %p986_p12, %p985_p2 }
  0x21   : > { %p981_p1 = pneg %p980_p10 }
  0x23   : > { %p988_p6 = pnand %p987_p0, %p981_p1 }
  0x25   : > { %991 = shalt.err (!%p988_p6)
}
  0x26   : > { %s1124_s15 = smov 64   ;;  %s1125_s16 = smov 4  }
  0x27   : > { %847 = dma.hbm_to_vmem [thread:$0]  (!%p1214_p11), %s1415_s1, 1024, %s1207_s28, [#allocation6], %s1124_s15, %s1124_s15, %s1125_s16  }
  0x28   : > { %s992_s7 = scalar_lea.hbm %s1417_s3, 2048 }
  0x29   : > { %p993_p1 = scmp.ne.s32.totalorder %s1417_s3, %s992_s7  ;;  %p999_p10 = scmp.lt.u32.totalorder %s992_s7, %s1417_s3 }
  0x2b   : > { %p995_p2 = pnand %p993_p1, %p966_p13 }
  0x2d   : > { %p996_p6 = pneg %p995_p2 }
  0x2f   : > { %p1001_p3 = pnand %p999_p10, %p996_p6 }
  0x31   : > { %1004 = shalt.err (!%p1001_p3)
}
  0x32   : > { %s1005_s28 = scalar_lea.vmem %s1218_s6, 2048  ;;  %p1013_p12 = scmp.lt.s32.totalorder %s1218_s6, %s1218_s6 }
  0x33   : > { %p1006_p5 = scmp.ne.s32.totalorder %s1218_s6, %s1005_s28  ;;  %p1014_p0 = scmp.lt.s32.totalorder %s1005_s28, %s1005_s28 }
  0x35   : > { %p1008_p7 = pnand %p1006_p5, %p966_p13  ;;  %p1015_p1 = por %p1014_p0, %p1013_p12 }
  0x37   : > { %p1009_p9 = pneg %p1008_p7 }
  0x39   : > { %p1016_p2 = pnand %p1015_p1, %p1009_p9 }
  0x3b   : > { %1019 = shalt.err (!%p1016_p2)
}
  0x3c   : > { %s1126_s12 = smov 128   ;;  %s1127_s13 = smov 8  }
  0x3d   : > { %850 = dma.hbm_to_vmem [thread:$0]  (!%p1214_p11), %s1417_s3, 2048, %s1218_s6, [#allocation6], %s1126_s12, %s1126_s12, %s1127_s13  }
  0x3e   : > { %s1276_s23 = sadd.s32 1, %s1120_s21   ;;  %s29_s30 = sadd.s32 1, %s1116_s20 }
  0x3f   : > { %s26_s27 = ssub.s32 %s1120_s21, %s1276_s23  ;;  %p36_p6 = scmp.ne.s32.totalorder %s1116_s20, %s1112_s19 }
  0x40   : > { %p27_p13 = scmp.eq.s32.totalorder %s26_s27, 0  ;;  %p37_p10 = scmp.eq.s32.totalorder %s1120_s21, 0 }
  0x41   : > { %p1427_p5 = scmp.eq.s32.totalorder %s1184_s22, 1  ;;  %p861_p9 = scmp.lt.s32.totalorder %s1120_s21, 2 }
  0x42   : > { %s1285_s7 = scalar_select %p27_p13, %s1116_s20, %s29_s30  }
  0x43   : > { %p38_p3 = por %p37_p10, %p36_p6  ;;  %p1289_p7 = por %p1427_p5, %p36_p6 }
  0x44   : > { %s208_s29 = sand.u32 1, %s1116_s20   ;;  %s799_s6 = sshll.u32 %s1120_s21, 8 }
  0x45   : > { %s1428_s8 = scalar_select %p1289_p7, 1, 0 }
  0x46   : > { %s758_s9 = sshll.u32 %s208_s29, 4  ;;  %s1299_s28 = scalar_lea.hbm %s1414_s0, %s799_s6 }
  0x47   : > { %s212_s12 = scalar_lea.vmem [#allocation2], %s758_s9  ;;  %p1303_p11 = pnand %p861_p9, %p38_p3 }
  0x48   : > { %s219_s13 = sshll.u32 %s212_s12, 4  ;;  %s1307_s17 = scalar_lea.sflag [#allocation3], %s208_s29  ;;  %s1301_s13 = int_to_ptr.vmem [resolvable:$true] %s219_s13 }
  0x49   : > { %s1020_s27 = scalar_lea.hbm %s1299_s28, 256  ;;  %p1022_p0 = pneg %p1303_p11 }
  0x4a   : > { %p1021_p12 = scmp.ne.s32.totalorder %s1299_s28, %s1020_s27  ;;  %s1025_s6 = scalar_lea.hbm %s1414_s0, 512 }
  0x4b   : > { %p1026_p13 = scmp.lt.u32.totalorder %s1299_s28, %s1414_s0  ;;  %p1027_p6 = scmp.lt.u32.totalorder %s1025_s6, %s1020_s27 }
  0x4c   : > { %p1023_p1 = pnand %p1022_p0, %p1021_p12  ;;  %p1029_p3 = scmp.lt.u32.totalorder %s1020_s27, %s1299_s28 }
  0x4d   : > { %p1028_p10 = por %p1027_p6, %p1026_p13 }
  0x4e   : > { %p1024_p2 = pneg %p1023_p1 }
  0x4f   : > { %p1030_p5 = por %p1029_p3, %p1028_p10 }
  0x51   : > { %p1031_p9 = pnand %p1030_p5, %p1024_p2 }
  0x53   : > { %1034 = shalt.err (!%p1031_p9)
}
  0x54   : > { %s1035_s29 = scalar_lea.vmem %s1301_s13, 256  ;;  %s1128_s12 = smov [#allocation2]  }
  0x55   : > { %p1036_p12 = scmp.ne.s32.totalorder %s1301_s13, %s1035_s29  ;;  %s1040_s30 = sshll.u32 %s1128_s12, 4  ;;  %s1041_s30 = int_to_ptr.vmem [resolvable:$false] %s1040_s30 }
  0x56   : > { %s1042_s9 = scalar_lea.vmem %s1041_s30, 512  ;;  %p1043_p4 = scmp.lt.s32.totalorder %s1301_s13, %s1041_s30 }
  0x57   : > { %p1038_p1 = pnand %p1036_p12, %p1022_p0  ;;  %p1044_p13 = scmp.lt.s32.totalorder %s1042_s9, %s1035_s29 }
  0x59   : > { %p1039_p7 = pneg %p1038_p1  ;;  %p1045_p6 = por %p1044_p13, %p1043_p4 }
  0x5b   : > { %p1046_p10 = pnand %p1045_p6, %p1039_p7 }
  0x5d   : > { %1049 = shalt.err (!%p1046_p10)
}
  0x5e   : > { %854 = dma.hbm_to_vmem [thread:$0]  (!%p1303_p11), %s1299_s28, 256, %s1301_s13, %s1307_s17, %s1124_s15, %s1124_s15, %s1125_s16  }
  0x5f   : > { %231 = sbr.rel (%p1203_p8) target bundleno = 919 (0x397), region = 40  ;;  %s1341_s27 = sand.u32 (!%p1203_p8), 1, %s1112_s19  }
  0x60   : > { %s762_s6 = sshll.u32 (!%p1203_p8), %s1341_s27, 4  ;;  %s234_s10 = scalar_lea.sflag (!%p1203_p8), [#allocation3], %s1341_s27 }
  0x61   : > { %s1345_s11 = scalar_lea.vmem (!%p1203_p8), [#allocation2], %s762_s6  ;;  %p1430_p4 = scmp.ne.s32.totalorder (!%p1203_p8), %s1423_s24, 0 }
  0x66   : > { %1095 = dma.done.wait (%p1430_p4), %s234_s10, 256  }
  0x67   : > { %1097 = vsyncadd (%p1430_p4), %s234_s10, 4294967040  ;;  %p1431_p7 = scmp.eq.s32.totalorder %s1184_s22, 0 }
  0x69   : > { %1099 = dma.done.wait (%p1431_p7), [#allocation6], 3072   ;;  %p1432_p8 = pmov %p1431_p7 }
  0x6a   : > { %v906_v0 = vld [vmem:[#allocation5] sm:$0xff]   ;;  %v907_v1 = vld [vmem:[#allocation5 + $0x8] sm:$0xff]   ;;  %v908_v2 = vld [vmem:[#allocation5 + $0x10] sm:$0xff]   ;;  %v1129_v26 = vmov 0   ;;  %v435_v42 = vlaneseq  ;;  %s765_s28 = sshll.u32 %s1341_s27, 6  ;;  %s801_s14 = sshll.u32 %s1184_s22, 10 }
  0x6b   : > { %1101 = vsyncadd (%p1432_p8), [#allocation6], 4294964224  ;;  %812 = vmatprep.subr.bf16.mxu0 %v906_v0  ;;  %v909_v3 = vld [vmem:[#allocation5 + $0x18] sm:$0xff]   ;;  %v914_v4 = vld [vmem:[%s1345_s11] sm:$0xff]   ;;  %557 = vmatprep.mubr.bf16.mxu1 %v1129_v26  ;;  %s271_s13 = scalar_lea.vmem [#allocation8], %s765_s28  ;;  %s1368_s30 = scalar_lea.hbm %s1419_s5, %s801_s14 }
  0x6c   : > { %813 = vmatpush3.bf16.msra.mxu0 %v906_v0  ;;  %828 = vmatprep.mubr.bf16.mxu0 %v914_v4  ;;  %v916_v5 = vld [vmem:[#allocation7 + $0x4] ss:$8 sps:$4 sm:$0xff]   ;;  %v918_v6 = vld [vmem:[#allocation7] ss:$8 sps:$4 sm:$0xff]   ;;  %v919_v8 = vld [vmem:[#allocation7 + $0x14] ss:$8 sps:$4 sm:$0xff]  }
  0x6d   : > { %814 = vmatprep.subr.bf16.mxu0 %v907_v1  ;;  %v910_v7 = vld [vmem:[#allocation5 + $0x20] sm:$0xff]   ;;  %525 = vmatprep.subr.bf16.mxu1 %v916_v5  ;;  %v921_v9 = vld [vmem:[#allocation7 + $0x10] ss:$8 sps:$4 sm:$0xff]   ;;  %v911_v11 = vld [vmem:[#allocation5 + $0x28] sm:$0xff]   ;;  %v436_v43 = vshrl.u32 %v435_v42, 7  ;;  %s661_s17 = sshll.u32 %s271_s13, 4  ;;  %s1370_s17 = int_to_ptr.vmem [resolvable:$true] %s661_s17 }
  0x6e   : > { %526 = vmatpush1.bf16.msra.mxu1 %v918_v6  ;;  %v922_v10 = vld [vmem:[#allocation7 + $0x24] ss:$8 sps:$4 sm:$0xff]   ;;  %v924_v12 = vld [vmem:[#allocation7 + $0x20] ss:$8 sps:$4 sm:$0xff]   ;;  %v925_v13 = vld [vmem:[#allocation7 + $0x34] ss:$8 sps:$4 sm:$0xff]  }
  0x6f   : > { %527 = vmatprep.subr.bf16.mxu1 %v919_v8  ;;  %v912_v14 = vld [vmem:[#allocation5 + $0x30] sm:$0xff]   ;;  %v928_v16 = vld [vmem:[#allocation7 + $0x44] ss:$8 sps:$4 sm:$0xff]   ;;  %v913_v17 = vld [vmem:[#allocation5 + $0x38] sm:$0xff]   ;;  %v437_v44 = vsub.s32 0, %v436_v43  ;;  %v441_v46 = vsub.s32 1, %v436_v43 }
  0x70   : > { %815 = vmatpush3.bf16.msra.mxu0 %v907_v1  ;;  %v927_v15 = vld [vmem:[#allocation7 + $0x30] ss:$8 sps:$4 sm:$0xff]   ;;  %v930_v18 = vld [vmem:[#allocation7 + $0x40] ss:$8 sps:$4 sm:$0xff]   ;;  %v931_v19 = vld [vmem:[#allocation7 + $0x54] ss:$8 sps:$4 sm:$0xff]  }
  0x71   : > { %816 = vmatprep.subr.bf16.mxu0 %v908_v2  ;;  %v933_v20 = vld [vmem:[#allocation7 + $0x50] ss:$8 sps:$4 sm:$0xff]   ;;  %v934_v22 = vld [vmem:[#allocation7 + $0x64] ss:$8 sps:$4 sm:$0xff]   ;;  %v936_v23 = vld [vmem:[#allocation7 + $0x60] ss:$8 sps:$4 sm:$0xff]  }
  0x72   : > { %528 = vmatpush1.bf16.msra.mxu1 %v921_v9  ;;  %v915_v21 = vld [vmem:[%s1345_s11 + $0x8] sm:$0xff]   ;;  %v766_v27 = vld [vmem:[%s1416_s2] ss:$0 sm:$0xff]  ;;  %s647_s9 = scalar_lea.sflag [#allocation4], %s1341_s27  ;;  %s1050_s22 = scalar_lea.vmem %s1370_s17, 1024 }
  0x73   : > { %529 = vmatprep.subr.bf16.mxu1 %v922_v10  ;;  %v937_v24 = vld [vmem:[#allocation7 + $0x74] ss:$8 sps:$4 sm:$0xff]   ;;  %v939_v25 = vld [vmem:[#allocation7 + $0x70] ss:$8 sps:$4 sm:$0xff]   ;;  %v433_v45 = vld [vmem:[%s1418_s4] sm:$0x3]  ;;  %p1051_p11 = scmp.ne.s32.totalorder %s1370_s17, %s1050_s22 }
  0x74   : > { %817 = vmatpush3.bf16.msra.mxu0 %v908_v2  ;;  %v438_v47 = vrot.slane %v433_v45, %v437_v44  ;;  %v442_v48 = vrot.slane %v433_v45, %v441_v46  ;;  %p1433_p0 = scmp.ne.s32.totalorder %s1428_s8, 0  ;;  %s1130_s6 = smov [#allocation8]  }
  0x75   : > { %818 = vmatprep.subr.bf16.mxu0 %v909_v3  ;;  %s1054_s10 = sshll.u32 %s1130_s6, 4  ;;  %s1055_s10 = int_to_ptr.vmem [resolvable:$false] %s1054_s10 }
  0x76   : > { %530 = vmatpush1.bf16.msra.mxu1 %v924_v12  ;;  %p1052_p2 = pnand %p1051_p11, %p1433_p0  ;;  %s1056_s11 = scalar_lea.vmem %s1055_s10, 2048 }
  0x77   : > { %531 = vmatprep.subr.bf16.mxu1 %v925_v13  ;;  %p1057_p5 = scmp.lt.s32.totalorder %s1370_s17, %s1055_s10  ;;  %p1058_p9 = scmp.lt.s32.totalorder %s1056_s11, %s1050_s22 }
  0x78   : > { %819 = vmatpush3.bf16.msra.mxu0 %v909_v3  ;;  %p1053_p3 = pneg %p1052_p2 }
  0x79   : > { %820 = vmatprep.subr.bf16.mxu0 %v910_v7  ;;  %p1059_p12 = por %p1058_p9, %p1057_p5 }
  0x7a   : > { %532 = vmatpush1.bf16.msra.mxu1 %v927_v15 }
  0x7b   : > { %533 = vmatprep.subr.bf16.mxu1 %v928_v16  ;;  %p1060_p1 = pnand %p1059_p12, %p1053_p3 }
  0x7c   : > { %821 = vmatpush3.bf16.msra.mxu0 %v910_v7 }
  0x7d   : > { %822 = vmatprep.subr.bf16.mxu0 %v911_v11 }
  0x7e   : > { %534 = vmatpush1.bf16.msra.mxu1 %v930_v18 }
  0x7f   : > { %535 = vmatprep.subr.bf16.mxu1 %v931_v19 }
  0x80   : > { %823 = vmatpush3.bf16.msra.mxu0 %v911_v11 }
  0x81   : > { %824 = vmatprep.subr.bf16.mxu0 %v912_v14 }
  0x82   : > { %536 = vmatpush1.bf16.msra.mxu1 %v933_v20 }
  0x83   : > { %537 = vmatprep.subr.bf16.mxu1 %v934_v22 }
  0x84   : > { %825 = vmatpush3.bf16.msra.mxu0 %v912_v14 }
  0x85   : > { %826 = vmatprep.subr.bf16.mxu0 %v913_v17 }
  0x86   : > { %538 = vmatpush1.bf16.msra.mxu1 %v936_v23 }
  0x87   : > { %539 = vmatprep.subr.bf16.mxu1 %v937_v24 }
  0x88   : > { %827 = vmatpush3.bf16.msra.mxu0 %v913_v17 }
  0x8a   : > { %540 = vmatpush1.bf16.msra.mxu1 %v939_v25 }
  0x8b   : > { %829 = vmatmul.mubr.bf16.vlgmr.msra.gmra.mrb[0].mxu0 %v915_v21 }
 0x15e   : > { %v830_v28 = vpop.f32.mrb[0].mxu0 }
 0x15f   : > { %v405_v29 = vadd.f32 %v830_v28, %v766_v27  ;;  %v396_v30 = vpop.f32.mrb[1].mxu0 }
 0x160   : > { %v397_v31 = vadd.f32 %v766_v27, %v396_v30  ;;  %v831_v32 = vpop.f32.mrb[2].mxu0 }
 0x161   : > { %v408_v33 = vadd.f32 %v831_v32, %v766_v27  ;;  %v399_v34 = vpop.f32.mrb[3].mxu0  ;;  %v413_v36 = vmax.f32 %v405_v29, 0.0 }
 0x162   : > { %v400_v35 = vadd.f32 %v766_v27, %v399_v34  ;;  %v411_v38 = vmax.f32 %v397_v31, 0.0 }
 0x163   : > { %v414_v37 = vmax.f32 %v408_v33, 0.0 }
 0x164   : > { %v412_v39 = vmax.f32 %v400_v35, 0.0 }
 0x165   : > { %v416_v40 = vpack.c.bf16 %v414_v37, %v413_v36 }
 0x166   : > { %v415_v41 = vpack.c.bf16 %v412_v39, %v411_v38 }
 0x168   : > { %558 = vmatmul.mubr.bf16.vlgmr.msra.gmra.mrb[0].mxu1 %v415_v41 }
 0x169   : > { %567 = vmatprep.mubr.bf16.mxu1 %v1129_v26 }
 0x170   : > { %568 = vmatmul.mubr.bf16.gmra.mrb[4].mxu1 %v416_v40 }
 0x23b   : > { %v559_v49 = vpop.f32.mrb[0].mxu1 }
 0x23c   : > { %v560_v50 = vadd.f32 %v559_v49, %v438_v47  ;;  %v561_v51 = vpop.f32.mrb[1].mxu1 }
 0x23d   : > { %v562_v52 = vadd.f32 %v561_v51, %v442_v48  ;;  %v563_v53 = vpop.f32.mrb[2].mxu1 }
 0x23e   : > { %v565_v54 = vpop.f32.mrb[3].mxu1  ;;  %v564_v55 = vadd.f32 %v563_v53, %v438_v47 }
 0x23f   : > { %v566_v56 = vadd.f32 %v565_v54, %v442_v48  ;;  %v578_v57 = vmax.f32 %v560_v50, %v562_v52 }
 0x241   : > { %579 = vmax.xlane.f32.xlu0 %v578_v57  ;;  %v581_v59 = vmax.f32 %v564_v55, %v566_v56 }
 0x243   : > { %v569_v58 = vpop.f32.mrb[4].mxu1 }
 0x244   : > { %v570_v60 = vadd.f32 %v569_v58, %v438_v47  ;;  %v571_v61 = vpop.f32.mrb[5].mxu1 }
 0x245   : > { %v572_v62 = vadd.f32 %v571_v61, %v442_v48  ;;  %v573_v63 = vpop.f32.mrb[6].mxu1  ;;  %582 = vmax.xlane.f32.xlu0 %v581_v59 }
 0x246   : > { %v575_v0 = vpop.f32.mrb[7].mxu1  ;;  %v574_v1 = vadd.f32 %v573_v63, %v438_v47 }
 0x247   : > { %v576_v2 = vadd.f32 %v575_v0, %v442_v48  ;;  %v584_v3 = vmax.f32 %v570_v60, %v572_v62 }
 0x249   : > { %585 = vmax.xlane.f32.xlu1 %v584_v3  ;;  %v587_v4 = vmax.f32 %v574_v1, %v576_v2 }
 0x24d   : > { %588 = vmax.xlane.f32.xlu1 %v587_v4 }
 0x2ce   : > { %v580_v5 = vpop.xlane.xlu0 %579 }
 0x2cf   : > { %v590_v6 = vsub.f32 %v560_v50, %v580_v5  ;;  %v591_v7 = vsub.f32 %v562_v52, %v580_v5 }
 0x2d1   : > { %v598_v8 = vmul.f32 1.442695, %v590_v6  ;;  %v600_v9 = vmul.f32 1.442695, %v591_v7 }
 0x2d2   : > { %v583_v10 = vpop.xlane.xlu0 %582 }
 0x2d3   : > { %940 = vpow2.f32 %v598_v8  ;;  %v592_v11 = vsub.f32 %v564_v55, %v583_v10  ;;  %v593_v12 = vsub.f32 %v566_v56, %v583_v10 }
 0x2d4   : > { %942 = vpow2.f32 %v600_v9 }
 0x2d5   : > { %v602_v13 = vmul.f32 1.442695, %v592_v11  ;;  %v604_v14 = vmul.f32 1.442695, %v593_v12 }
 0x2d6   : > { %v586_v15 = vpop.xlane.xlu1 %585 }
 0x2d7   : > { %944 = vpow2.f32 %v602_v13  ;;  %v594_v16 = vsub.f32 %v570_v60, %v586_v15  ;;  %v595_v17 = vsub.f32 %v572_v62, %v586_v15 }
 0x2d8   : > { %946 = vpow2.f32 %v604_v14 }
 0x2d9   : > { %v606_v18 = vmul.f32 1.442695, %v594_v16  ;;  %v608_v19 = vmul.f32 1.442695, %v595_v17 }
 0x2da   : > { %v589_v20 = vpop.xlane.xlu1 %588 }
 0x2db   : > { %948 = vpow2.f32 %v606_v18  ;;  %v596_v21 = vsub.f32 %v574_v1, %v589_v20  ;;  %v597_v22 = vsub.f32 %v576_v2, %v589_v20 }
 0x2dc   : > { %950 = vpow2.f32 %v608_v19 }
 0x2dd   : > { %v941_v23 = vpop.eup %940  ;;  %v610_v24 = vmul.f32 1.442695, %v596_v21  ;;  %v612_v25 = vmul.f32 1.442695, %v597_v22 }
 0x2de   : > { %v943_v26 = vpop.eup %942 }
 0x2df   : > { %952 = vpow2.f32 %v610_v24  ;;  %v614_v27 = vadd.f32 %v943_v26, %v941_v23 }
 0x2e0   : > { %954 = vpow2.f32 %v612_v25 }
 0x2e1   : > { %v945_v28 = vpop.eup %944  ;;  %615 = vadd.xlane.f32.xlu0 %v614_v27 }
 0x2e2   : > { %v947_v29 = vpop.eup %946 }
 0x2e3   : > { %v617_v30 = vadd.f32 %v947_v29, %v945_v28 }
 0x2e5   : > { %v949_v31 = vpop.eup %948  ;;  %618 = vadd.xlane.f32.xlu1 %v617_v30 }
 0x2e6   : > { %v951_v32 = vpop.eup %950 }
 0x2e7   : > { %v620_v33 = vadd.f32 %v951_v32, %v949_v31 }
 0x2e9   : > { %v953_v34 = vpop.eup %952  ;;  %621 = vadd.xlane.f32.xlu0 %v620_v33 }
 0x2ea   : > { %v955_v35 = vpop.eup %954 }
 0x2eb   : > { %v623_v36 = vadd.f32 %v955_v35, %v953_v34 }
 0x2ed   : > { %624 = vadd.xlane.f32.xlu1 %v623_v36 }
 0x36e   : > { %v616_v37 = vpop.xlane.xlu0 %615 }
 0x36f   : > { %956 = vrcp.f32 %v616_v37 }
 0x372   : > { %v619_v38 = vpop.xlane.xlu1 %618 }
 0x373   : > { %958 = vrcp.f32 %v619_v38 }
 0x376   : > { %v622_v39 = vpop.xlane.xlu0 %621 }
 0x377   : > { %960 = vrcp.f32 %v622_v39 }
 0x379   : > { %v957_v40 = vpop.eup %956 }
 0x37a   : > { %v627_v41 = vmul.f32 %v957_v40, %v941_v23  ;;  %v628_v42 = vmul.f32 %v957_v40, %v943_v26  ;;  %v625_v43 = vpop.xlane.xlu1 %624 }
 0x37b   : > { %962 = vrcp.f32 %v625_v43 }
 0x37c   : > { %638 = vst [vmem:[%s271_s13] sm:$0xff] %v627_v41  ;;  %639 = vst [vmem:[%s271_s13 + $0x8] sm:$0xff] %v628_v42 }
 0x37d   : > { %v959_v44 = vpop.eup %958 }
 0x37e   : > { %v630_v45 = vmul.f32 %v959_v44, %v945_v28  ;;  %v631_v46 = vmul.f32 %v959_v44, %v947_v29 }
 0x380   : > { %640 = vst [vmem:[%s271_s13 + $0x10] sm:$0xff] %v630_v45  ;;  %641 = vst [vmem:[%s271_s13 + $0x18] sm:$0xff] %v631_v46 }
 0x381   : > { %v961_v47 = vpop.eup %960 }
 0x382   : > { %v633_v48 = vmul.f32 %v961_v47, %v949_v31  ;;  %v634_v49 = vmul.f32 %v961_v47, %v951_v32 }
 0x384   : > { %642 = vst [vmem:[%s271_s13 + $0x20] sm:$0xff] %v633_v48  ;;  %643 = vst [vmem:[%s271_s13 + $0x28] sm:$0xff] %v634_v49 }
 0x385   : > { %v963_v50 = vpop.eup %962 }
 0x386   : > { %v636_v51 = vmul.f32 %v963_v50, %v953_v34  ;;  %v637_v52 = vmul.f32 %v963_v50, %v955_v35 }
 0x388   : > { %644 = vst [vmem:[%s271_s13 + $0x30] sm:$0xff] %v636_v51  ;;  %645 = vst [vmem:[%s271_s13 + $0x38] sm:$0xff] %v637_v52 }
 0x389   : > { %1063 = shalt.err (!%p1060_p1)
}
 0x38a   : > { %s1064_s24 = scalar_lea.hbm %s1368_s30, 1024  ;;  %s1068_s16 = scalar_lea.hbm %s1419_s5, 2048 }
 0x38b   : > { %p1065_p13 = scmp.ne.s32.totalorder %s1368_s30, %s1064_s24  ;;  %p1069_p4 = scmp.lt.u32.totalorder %s1368_s30, %s1419_s5 }
 0x38c   : > { %p1070_p7 = scmp.lt.u32.totalorder %s1068_s16, %s1064_s24  ;;  %p1072_p11 = scmp.lt.u32.totalorder %s1064_s24, %s1368_s30 }
 0x38d   : > { %p1066_p6 = pnand %p1065_p13, %p1433_p0 }
 0x38e   : > { %p1071_p8 = por %p1070_p7, %p1069_p4 }
 0x38f   : > { %p1067_p10 = pneg %p1066_p6 }
 0x390   : > { %p1073_p2 = por %p1072_p11, %p1071_p8 }
 0x392   : > { %p1074_p3 = pnand %p1073_p2, %p1067_p10 }
 0x394   : > { %1077 = shalt.err (!%p1074_p3)
}
 0x395   : > { %s1131_s14 = smov 256   ;;  %s1132_s29 = smov 16  }
 0x396   : > { %842 = dma.vmem_to_hbm [thread:$0]  (%p1433_p0), %s1370_s17, 1024, %s1368_s30, %s647_s9, %s1131_s14, %s1131_s14, %s1132_s29  }
 0x397 PF: > { %s676_s12 = sand.u32 1, %s1108_s18   ;;  %p1434_p5 = scmp.ne.s32.totalorder %s1424_s25, 0 }
 0x398   : > { %p1435_p9 = scmp.ge.s32.totalorder %s1120_s21, 2  ;;  %s677_s22 = scalar_lea.sflag [#allocation4], %s676_s12 }
 0x39a   : > { %p856_p12 = pnand %p1435_p9, %p1434_p5 }
 0x39c   : > { %1103 = dma.done.wait (!%p856_p12), %s677_s22, 1024  }
 0x39d   : > { %1105 = vsyncadd (!%p856_p12), %s677_s22, 4294966272  ;;  %p19_p1 = scmp.ge.s32.totalorder %s1276_s23, 4   ;;  %s1436_s18 = smov %s1112_s19 }
 0x39e   : > { %s1437_s19 = smov %s1116_s20  ;;  %s1438_s20 = smov %s1285_s7 }
 0x39f   : > { %s1439_s21 = smov %s1276_s23  ;;  %21 = sbr.rel (!%p19_p1) target bundleno = 6 (0x6), region = 93 }
 0x3a6   :  { %682 = vsyncpa [#allocation3], 1 }
 0x3a7   :  { %684 = vsyncpa [#allocation3 + $0x1], 1 }
 0x3a8   :  { %685 = vsyncpa [#allocation6], 1 }
 0x3a9   :  { %686 = vsyncpa [#allocation4], 1 }
 0x3aa   :  { %688 = vsyncpa [#allocation4 + $0x1], 1 }

</bundles_post_ra>
